<compile_context>
chip_gen: v7x
topology: tpu7x:2x2x1
jax: 0.10.0
libtpu: 0.0.40
codegen_flags: <defaults>
</compile_context>

<pallas_src>
import jax
import jax.numpy as jnp
import numpy as np
from jax.experimental import pallas as pl
from jax.experimental.pallas import tpu as pltpu


# ----------------------------------------------------------------------------
# Fused kernel: 3x3 conv (as one banded matmul) + bias + ReLU
#               + lane-dense feature write + running GAP column sums.
# ----------------------------------------------------------------------------
def _gradcam_fused_kernel(x_ref, w_ref, b_ref, feat_ref, pool_ref):
    # x_ref   : (TH, 3*(W+2)*C_in)       bf16  lane-packed, dy-halo-stacked rows
    # w_ref   : (3*(W+2)*C_in, W*C_feat) bf16  block-Toeplitz conv weight
    # b_ref   : (1, W*C_feat)            f32   conv bias tiled over w
    # feat_ref: (TH, W*C_feat)           f32   packed feature rows for this tile
    # pool_ref: (1, W*C_feat)            f32   per-image running column sums (GAP)
    acc = jnp.dot(x_ref[...], w_ref[...], preferred_element_type=jnp.float32)
    acc = jnp.maximum(acc + b_ref[...], 0.0)        # bias + ReLU in f32
    feat_ref[...] = acc.astype(feat_ref.dtype)      # single lane-dense store

    # Fused global-average-pool numerator.  pool_ref's block index is constant
    # along the row-tile axis r, so it stays VMEM-resident across r (that axis
    # is "arbitrary" / sequential per image); initialize on the first tile.
    @pl.when(pl.program_id(1) == 0)
    def _():
        pool_ref[...] = jnp.zeros_like(pool_ref)
    pool_ref[...] += jnp.sum(acc, axis=0, keepdims=True)

    # TODO(synk): out.register_hook(grad_extractor) is a backward-pass gradient
    # hook; it has no forward-compute equivalent.


# ----------------------------------------------------------------------------
# Wrapper helpers
# ----------------------------------------------------------------------------
def _pick_row_tile(h):
    """Whole image per step when small (block == full dims is always legal);
    otherwise the largest multiple-of-8 divisor so the (8,128) rule holds."""
    if h <= 256:
        return h
    for th in range(256, 7, -8):
        if h % th == 0:
            return th
    return h


def _banded_conv_weight(w_conv, W):
    """(3, 3, C_in, C_feat) 3x3 weight -> (3*(W+2)*C_in, W*C_feat)
    block-Toeplitz matrix so the padded conv becomes ONE lane-dense matmul per
    row band.  O(W^2 * C_in * C_feat) elements: fine for GradCAM-sized feature
    maps; for very wide maps fall back to per-dx matmuls."""
    _, _, C_in, C_feat = w_conv.shape
    u = jnp.arange(W + 2)[:, None]            # padded input column
    w = jnp.arange(W)[None, :]                # output column
    dx = u - w                                # tap index, valid in [0, 2]
    valid = (dx >= 0) & (dx <= 2)
    dx_c = jnp.clip(dx, 0, 2)
    band = jnp.where(valid[None, :, :, None, None],
                     w_conv[:, dx_c], 0.0)    # (3, W+2, W, C_in, C_feat)
    band = band.transpose(0, 1, 3, 2, 4)      # (3, W+2, C_in, W, C_feat)
    return band.reshape(3 * (W + 2) * C_in, W * C_feat)


# ----------------------------------------------------------------------------
# Wrapper: GradCamHook.forward -> (logits, conv_features_NHWC)
# ----------------------------------------------------------------------------
def gradcam_hook_forward(x_nchw, params):
    B, C_in, H, W = x_nchw.shape
    KH, KW, _, C_feat = params["w_conv"].shape
    NC = params["w_cls"].shape[1]
    assert (KH, KW) == (3, 3)

    TH = _pick_row_tile(H)
    n_r = H // TH
    K_tot = 3 * (W + 2) * C_in
    WN = W * C_feat                       # packed lane width of the features

    # Tiny input prep (one fused XLA pass over the small input tensor):
    # NCHW -> NHWC bf16, 1-px zero halo, and the three dy-shifted row bands
    # stacked along lanes so the kernel never does sub-8 sublane slices.
    x_nhwc = jnp.transpose(x_nchw, (0, 2, 3, 1)).astype(jnp.bfloat16)
    x_pad = jnp.pad(x_nhwc, ((0, 0), (1, 1), (1, 1), (0, 0)))   # (B,H+2,W+2,C_in)
    x_stack = jnp.stack([x_pad[:, dy:dy + H] for dy in range(3)], axis=2)
    x_stack = x_stack.reshape(B, H, K_tot)                      # (B,H,3*(W+2)*C_in)

    w_band = _banded_conv_weight(params["w_conv"], W).astype(jnp.bfloat16)
    b_tile = jnp.tile(params["b_conv"], (1, W))                 # (1, W*C_feat) f32

    feats_packed, pool_packed = pl.pallas_call(
        _gradcam_fused_kernel,
        out_shape=(
            jax.ShapeDtypeStruct((B, H, WN), jnp.float32),      # packed features
            jax.ShapeDtypeStruct((B, 1, WN), jnp.float32),      # GAP column sums
        ),
        grid=(B, n_r),
        in_specs=[
            pl.BlockSpec((None, TH, K_tot), lambda b, r: (b, r, 0)),
            pl.BlockSpec((K_tot, WN), lambda b, r: (0, 0)),
            pl.BlockSpec((1, WN), lambda b, r: (0, 0)),
        ],
        out_specs=(
            pl.BlockSpec((None, TH, WN), lambda b, r: (b, r, 0)),
            # constant block index along r -> VMEM-resident accumulator
            pl.BlockSpec((None, 1, WN), lambda b, r: (b, 0, 0)),
        ),
        compiler_params=pltpu.CompilerParams(
            dimension_semantics=("parallel", "arbitrary")),
    )(x_stack, w_band, b_tile)

    # conv_feature.set_features(out): NHWC features via a free reshape
    # (no NCHW transpose round trip through HBM).
    conv_features_nhwc = feats_packed.reshape(B, H, W, C_feat)

    # predict_layer: finish the GAP and apply the Linear head as one small
    # batched XLA matmul (hoisted degenerate M=1 matmul out of the kernel).
    pooled = pool_packed.reshape(B, W, C_feat).sum(axis=1) / float(H * W)
    logits = jnp.matmul(pooled, params["w_cls"],
                        precision=jax.lax.Precision.HIGHEST) + params["b_cls"][0]
    return logits, conv_features_nhwc


# ----------------------------------------------------------------------------
# Pure-JAX reference (same bf16 rounding of matmul inputs) + params.
# ----------------------------------------------------------------------------
def reference_forward(x_nchw, params):
    B, C_in, H, W = x_nchw.shape
    C_feat = params["w_conv"].shape[-1]
    x = jnp.transpose(x_nchw, (0, 2, 3, 1)).astype(jnp.bfloat16).astype(jnp.float32)
    xp = jnp.pad(x, ((0, 0), (1, 1), (1, 1), (0, 0)))
    w = params["w_conv"].astype(jnp.bfloat16).astype(jnp.float32)
    acc = jnp.zeros((B, H, W, C_feat), jnp.float32)
    for dy in range(3):
        for dx in range(3):
            acc = acc + jnp.einsum("bhwc,cf->bhwf",
                                   xp[:, dy:dy + H, dx:dx + W, :], w[dy, dx],
                                   precision=jax.lax.Precision.HIGHEST)
    feats = jnp.maximum(acc + params["b_conv"][0], 0.0)
    pooled = feats.reshape(B, H * W, C_feat).mean(axis=1)
    logits = jnp.matmul(pooled, params["w_cls"],
                        precision=jax.lax.Precision.HIGHEST) + params["b_cls"][0]
    return logits, feats


def init_params(key, c_in=4, c_feat=8, num_classes=10):
    k1, k2, k3, k4 = jax.random.split(key, 4)
    # Conv weight stored as (KH, KW, C_in, C_feat).  A real PyTorch Conv2d
    # weight of shape (C_out, C_in, KH, KW) maps here via w.transpose(2,3,1,0).
    w_conv = 0.1 * jax.random.normal(k1, (3, 3, c_in, c_feat), jnp.float32)
    b_conv = 0.1 * jax.random.normal(k2, (1, c_feat), jnp.float32)
    w_cls = 0.1 * jax.random.normal(k3, (c_feat, num_classes), jnp.float32)
    b_cls = 0.1 * jax.random.normal(k4, (1, num_classes), jnp.float32)
    return {"w_conv": w_conv, "b_conv": b_conv, "w_cls": w_cls, "b_cls": b_cls}


if __name__ == "__main__":
    key = jax.random.PRNGKey(0)
    k_x, k_p = jax.random.split(key)

    B, C_in, H, W = 2, 4, 16, 16
    x = jax.random.normal(k_x, (B, C_in, H, W), jnp.float32)  # NCHW like PyTorch
    params = init_params(k_p, c_in=C_in, c_feat=8, num_classes=10)

    fwd = jax.jit(gradcam_hook_forward)
    logits, conv_features = fwd(x, params)
    jax.block_until_ready(logits)
    jax.block_until_ready(conv_features)

    assert logits.shape == (B, 10)
    assert conv_features.shape == (B, H, W, 8)

    ref_logits, ref_features = reference_forward(x, params)
    np.testing.assert_allclose(np.asarray(logits), np.asarray(ref_logits),
                               rtol=1e-2, atol=1e-2)
    np.testing.assert_allclose(np.asarray(conv_features), np.asarray(ref_features),
                               rtol=1e-2, atol=1e-2)
    print("KERNEL_OK")
</pallas_src>

<mosaic_0001>
module attributes {stable_mosaic.version = 11 : i64} {
  func.func @_gradcam_fused_kernel(%arg0: i32, %arg1: i32, %arg2: memref<1x16x216xbf16, #tpu.memory_space<vmem>>, %arg3: memref<216x128xbf16, #tpu.memory_space<vmem>>, %arg4: memref<1x128xf32, #tpu.memory_space<vmem>>, %arg5: memref<1x16x128xf32, #tpu.memory_space<vmem>>, %arg6: memref<1x1x128xf32, #tpu.memory_space<vmem>>) attributes {dimension_semantics = [#tpu.dimension_semantics<parallel>, #tpu.dimension_semantics<arbitrary>], iteration_bounds = array<i64: 2, 1>, scalar_prefetch = 0 : i64, scratch_operands = 0 : i64, tpu.core_type = #tpu.core_type<tc>, window_params = [{transform_indices = @transform_0, window_bounds = array<i64: 1, 16, 216>}, {pipeline_mode = #tpu.pipeline_mode<synchronous>, transform_indices = @transform_1, window_bounds = array<i64: 216, 128>}, {pipeline_mode = #tpu.pipeline_mode<synchronous>, transform_indices = @transform_2, window_bounds = array<i64: 1, 128>}, {transform_indices = @transform_3, window_bounds = array<i64: 1, 16, 128>}, {transform_indices = @transform_4, window_bounds = array<i64: 1, 1, 128>}]} {
    %c0 = arith.constant 0 : index
    %c0_0 = arith.constant 0 : index
    %c0_1 = arith.constant 0 : index
    %0 = vector.load %arg2[%c0, %c0_0, %c0_1] : memref<1x16x216xbf16, #tpu.memory_space<vmem>>, vector<1x16x216xbf16>
    %1 = vector.shape_cast %0 : vector<1x16x216xbf16> to vector<16x216xbf16>
    %c0_2 = arith.constant 0 : index
    %c0_3 = arith.constant 0 : index
    %2 = vector.load %arg3[%c0_2, %c0_3] : memref<216x128xbf16, #tpu.memory_space<vmem>>, vector<216x128xbf16>
    %cst = arith.constant dense<0.000000e+00> : vector<16x128xf32>
    %3 = tpu.matmul %1, %2, %cst {dimension_numbers = #tpu.dot_dimension_numbers<[1], [0], [0], [1], [0, 0, 1, 1], [], []>} : vector<16x216xbf16>, vector<216x128xbf16>, vector<16x128xf32> -> vector<16x128xf32>
    %c0_4 = arith.constant 0 : index
    %c0_5 = arith.constant 0 : index
    %4 = vector.load %arg4[%c0_4, %c0_5] : memref<1x128xf32, #tpu.memory_space<vmem>>, vector<1x128xf32>
    %5 = vector.broadcast %4 : vector<1x128xf32> to vector<16x128xf32>
    %6 = arith.addf %3, %5 : vector<16x128xf32>
    %cst_6 = arith.constant 0.000000e+00 : f32
    %7 = vector.broadcast %cst_6 : f32 to vector<16x128xf32>
    %8 = arith.maximumf %6, %7 : vector<16x128xf32>
    %c0_7 = arith.constant 0 : index
    %c0_8 = arith.constant 0 : index
    %c0_9 = arith.constant 0 : index
    %9 = vector.load %arg5[%c0_7, %c0_8, %c0_9] : memref<1x16x128xf32, #tpu.memory_space<vmem>>, vector<1x16x128xf32>
    %10 = vector.shape_cast %9 : vector<1x16x128xf32> to vector<16x128xf32>
    %11 = vector.shape_cast %8 : vector<16x128xf32> to vector<1x16x128xf32>
    tpu.vector_store %arg5[%c0_7, %c0_8, %c0_9], %11 {strides = array<i32>} : memref<1x16x128xf32, #tpu.memory_space<vmem>>, vector<1x16x128xf32>,
    %c0_i32 = arith.constant 0 : i32
    %12 = arith.cmpi eq, %arg1, %c0_i32 : i32
    %13 = arith.extui %12 : i1 to i32
    %c0_i32_10 = arith.constant 0 : i32
    %14 = arith.cmpi ne, %13, %c0_i32_10 : i32
    scf.if %14 {
      %cst_18 = arith.constant 0.000000e+00 : f32
      %23 = vector.broadcast %cst_18 : f32 to vector<1x128xf32>
      %c0_19 = arith.constant 0 : index
      %c0_20 = arith.constant 0 : index
      %c0_21 = arith.constant 0 : index
      %24 = vector.load %arg6[%c0_19, %c0_20, %c0_21] : memref<1x1x128xf32, #tpu.memory_space<vmem>>, vector<1x1x128xf32>
      %25 = vector.shape_cast %24 : vector<1x1x128xf32> to vector<1x128xf32>
      %26 = vector.shape_cast %23 : vector<1x128xf32> to vector<1x1x128xf32>
      tpu.vector_store %arg6[%c0_19, %c0_20, %c0_21], %26 {strides = array<i32>} : memref<1x1x128xf32, #tpu.memory_space<vmem>>, vector<1x1x128xf32>,
    } else {
    }
    %c0_11 = arith.constant 0 : index
    %c0_12 = arith.constant 0 : index
    %c0_13 = arith.constant 0 : index
    %15 = vector.load %arg6[%c0_11, %c0_12, %c0_13] : memref<1x1x128xf32, #tpu.memory_space<vmem>>, vector<1x1x128xf32>
    %16 = vector.shape_cast %15 : vector<1x1x128xf32> to vector<1x128xf32>
    %cst_14 = arith.constant dense<0.000000e+00> : vector<128xf32>
    %17 = vector.multi_reduction <add>, %8, %cst_14 [0] : vector<16x128xf32> to vector<128xf32>
    %18 = vector.shape_cast %17 : vector<128xf32> to vector<1x128xf32>
    %19 = arith.addf %16, %18 : vector<1x128xf32>
    %c0_15 = arith.constant 0 : index
    %c0_16 = arith.constant 0 : index
    %c0_17 = arith.constant 0 : index
    %20 = vector.load %arg6[%c0_15, %c0_16, %c0_17] : memref<1x1x128xf32, #tpu.memory_space<vmem>>, vector<1x1x128xf32>
    %21 = vector.shape_cast %20 : vector<1x1x128xf32> to vector<1x128xf32>
    %22 = vector.shape_cast %19 : vector<1x128xf32> to vector<1x1x128xf32>
    tpu.vector_store %arg6[%c0_15, %c0_16, %c0_17], %22 {strides = array<i32>} : memref<1x1x128xf32, #tpu.memory_space<vmem>>, vector<1x1x128xf32>,
    return
  }
  func.func @transform_0(%arg0: i32, %arg1: i32) -> (i32, i32, i32) {
    %c0_i32 = arith.constant 0 : i32
    %c0_i32_0 = arith.constant 0 : i32
    return %arg0, %arg1, %c0_i32 : i32, i32, i32
  }
  func.func @transform_1(%arg0: i32, %arg1: i32) -> (i32, i32) {
    %c0_i32 = arith.constant 0 : i32
    %c0_i32_0 = arith.constant 0 : i32
    %c0_i32_1 = arith.constant 0 : i32
    return %c0_i32, %c0_i32_0 : i32, i32
  }
  func.func @transform_2(%arg0: i32, %arg1: i32) -> (i32, i32) {
    %c0_i32 = arith.constant 0 : i32
    %c0_i32_0 = arith.constant 0 : i32
    %c0_i32_1 = arith.constant 0 : i32
    return %c0_i32, %c0_i32_0 : i32, i32
  }
  func.func @transform_3(%arg0: i32, %arg1: i32) -> (i32, i32, i32) {
    %c0_i32 = arith.constant 0 : i32
    %c0_i32_0 = arith.constant 0 : i32
    return %arg0, %arg1, %c0_i32 : i32, i32, i32
  }
  func.func @transform_4(%arg0: i32, %arg1: i32) -> (i32, i32, i32) {
    %c0_i32 = arith.constant 0 : i32
    %c0_i32_0 = arith.constant 0 : i32
    %c0_i32_1 = arith.constant 0 : i32
    return %arg0, %c0_i32, %c0_i32_0 : i32, i32, i32
  }
}

</mosaic_0001>

<bundles_post_ra>
// kernel: gradcam_hook_forward.1
= control target key start
LH: loop header
LB: loop body
LE: loop exit
PB: predicated region body
PF: predicated region fallthrough
CT: control target
= control target key end

     0   :  { %s684_s15 = smov 0   ;;  %s686_s16 = smov 0   ;;  %s782_s0 = inlined_call_operand.vmem [shape: bf16[2,16,216], index: 0, kind: input, shape index: {}]   ;;  %s783_s1 = inlined_call_operand.vmem [shape: bf16[216,128], index: 1, kind: input, shape index: {}]   ;;  %s784_s2 = inlined_call_operand.vmem [shape: f32[1,128], index: 2, kind: input, shape index: {}]   ;;  %s785_s3 = inlined_call_operand.vmem [shape: f32[2,16,128], index: 3, kind: output, shape index: {0}]   ;;  %s786_s4 = inlined_call_operand.vmem [shape: f32[2,1,128], index: 4, kind: output, shape index: {1}]  }
   0x1   :  { %s688_s17 = smov 0  }
   0x2 LB: > { %s27_s18 = sadd.s32 1, %s651_s16  ;;  %p563_p0 = scmp.ge.s32.totalorder %s655_s17, 1  ;;  %s655_s17 = sphi %s688_s17, %s15_s17   ;;  %s651_s16 = sphi %s686_s16, %s788_s16   ;;  %s647_s15 = sphi %s684_s15, %s787_s15  }
   0x3   : > { %p29_p1 = scmp.ge.s32.totalorder %s27_s18, 2  ;;  %p187_p2 = scmp.lt.s32.totalorder %s655_s17, 3 }
   0x5   : > { %s790_s18 = smov (%p29_p1, %s27_s18), 0  ;;  %p188_p3 = pnand %p563_p0, %p187_p2 }
   0x6   : > { %v616_v0 = vld [vmem:[%s783_s1] sm:$0xff] (!%p188_p3)   ;;  %v657_v1 = vmov (!%p188_p3), 0   ;;  %v617_v2 = vld [vmem:[%s783_s1 + $0x8] sm:$0xff] (!%p188_p3)   ;;  %p226_p4 = scmp.lt.s32.totalorder (!%p188_p3), %s647_s15, 1  ;;  %v618_v3 = vld [vmem:[%s783_s1 + $0x10] sm:$0xff] (!%p188_p3)   ;;  %v658_v4 = vmov (!%p188_p3), 0.0  }
   0x7   : > { %191 = sbr.rel (%p188_p3) target bundleno = 298 (0x12a), region = 32  ;;  %384 = vmatprep.subr.bf16.mxu0 (!%p188_p3), %v657_v1  ;;  %v619_v5 = vld [vmem:[%s783_s1 + $0x18] sm:$0xff] (!%p188_p3)   ;;  %vm376_vm0 = vcmask (!%p188_p3), 719872   ;;  %v620_v6 = vld [vmem:[%s783_s1 + $0x20] sm:$0xff] (!%p188_p3)   ;;  %v621_v8 = vld [vmem:[%s783_s1 + $0x28] sm:$0xff] (!%p188_p3)   ;;  %vm380_vm1 = vcmask (!%p188_p3), 1043456  }
   0x8   : > { %385 = vmatpush1.bf16.msra.mxu0 (!%p188_p3), %v616_v0  ;;  %v622_v9 = vld [vmem:[%s783_s1 + $0x30] sm:$0xff] (!%p188_p3)   ;;  %v623_v10 = vld [vmem:[%s783_s1 + $0x38] sm:$0xff] (!%p188_p3)   ;;  %v624_v11 = vld [vmem:[%s783_s1 + $0x40] sm:$0xff] (!%p188_p3)  }
   0x9   : > { %386 = vmatprep.subr.bf16.mxu0 (!%p188_p3), %v657_v1  ;;  %v625_v12 = vld [vmem:[%s783_s1 + $0x48] sm:$0xff] (!%p188_p3)   ;;  %v626_v13 = vld [vmem:[%s783_s1 + $0x50] sm:$0xff] (!%p188_p3)   ;;  %v627_v14 = vld [vmem:[%s783_s1 + $0x58] sm:$0xff] (!%p188_p3)  }
   0xa   : > { %v628_v15 = vld [vmem:[%s783_s1 + $0x60] sm:$0xff] (!%p188_p3)   ;;  %v629_v16 = vld [vmem:[%s783_s1 + $0x68] ss:$0 sps:$4 sm:$0xff] (!%p188_p3)  }
   0xb   : > { %v382_v17 = vsel (!%p188_p3), %vm380_vm1, %v629_v16, 0  ;;  %v568_v19 = vld [vmem:[%s784_s2] ss:$0 sm:$0xff] (!%p188_p3) }
   0xc   : > { %387 = vmatpush1.bf16.msra.mxu0 (!%p188_p3), %v617_v2 }
   0xd   : > { %388 = vmatprep.subr.bf16.mxu0 (!%p188_p3), %v657_v1 }
   0xe   : > { %s792_s15 = smov (!%p226_p4, %s647_s15), 1 }
   0xf   : > { %s717_s27 = scalar_lea.vmem %s786_s4, %s792_s15  ;;  %s588_s28 = sshll.u32 %s792_s15, 4 }
  0x10   : > { %433 = vst [vmem:[%s717_s27] sm:$0x1] %v658_v4  ;;  %389 = vmatpush1.bf16.msra.mxu0 %v618_v3  ;;  %s729_s7 = scalar_lea.vmem %s782_s0, %s588_s28  ;;  %s244_s13 = scalar_lea.vmem %s785_s3, %s588_s28 }
  0x11   : > { %390 = vmatprep.subr.bf16.mxu0 %v657_v1  ;;  %v632_v7 = vld [vmem:[%s729_s7 + $0x4] ss:$8 sps:$4 sm:$0xff]   ;;  %v630_v18 = vld [vmem:[%s729_s7] ss:$8 sps:$4 sm:$0xff]  }
  0x12   : > { %585 = vmatprep.mubr.msk.bf16.mxu0 %vm376_vm0, %v632_v7 }
  0x14   : > { %391 = vmatpush1.bf16.msra.mxu0 %v619_v5 }
  0x15   : > { %392 = vmatprep.subr.bf16.mxu0 %v657_v1 }
  0x17   : > { %v434_v34 = vld [vmem:[%s717_s27] sm:$0x1] }
  0x18   : > { %393 = vmatpush1.bf16.msra.mxu0 %v620_v6 }
  0x19   : > { %394 = vmatprep.subr.bf16.mxu0 %v657_v1 }
  0x1c   : > { %395 = vmatpush1.bf16.msra.mxu0 %v621_v8 }
  0x1d   : > { %396 = vmatprep.subr.bf16.mxu0 %v657_v1 }
  0x20   : > { %397 = vmatpush1.bf16.msra.mxu0 %v622_v9 }
  0x21   : > { %398 = vmatprep.subr.bf16.mxu0 %v657_v1 }
  0x24   : > { %399 = vmatpush1.bf16.msra.mxu0 %v623_v10 }
  0x25   : > { %400 = vmatprep.subr.bf16.mxu0 %v657_v1 }
  0x28   : > { %401 = vmatpush1.bf16.msra.mxu0 %v624_v11 }
  0x29   : > { %402 = vmatprep.subr.bf16.mxu0 %v657_v1 }
  0x2c   : > { %403 = vmatpush1.bf16.msra.mxu0 %v625_v12 }
  0x2d   : > { %404 = vmatprep.subr.bf16.mxu0 %v657_v1 }
  0x30   : > { %405 = vmatpush1.bf16.msra.mxu0 %v626_v13 }
  0x31   : > { %406 = vmatprep.subr.bf16.mxu0 %v657_v1 }
  0x34   : > { %407 = vmatpush1.bf16.msra.mxu0 %v627_v14 }
  0x35   : > { %408 = vmatprep.subr.bf16.mxu0 %v657_v1 }
  0x38   : > { %409 = vmatpush1.bf16.msra.mxu0 %v628_v15 }
  0x39   : > { %410 = vmatprep.subr.bf16.mxu0 %v657_v1 }
  0x3c   : > { %411 = vmatpush1.bf16.msra.mxu0 %v382_v17 }
  0x3f   : > { %417 = vmatmul.mubr.bf16.vlgmr.msra.gmra.mrb[0].mxu0 %v630_v18 }
 0x112   : > { %v418_v20 = vpop.f32.mrb[0].mxu0 }
 0x113   : > { %v419_v21 = vadd.f32 %v568_v19, %v418_v20  ;;  %v420_v22 = vpop.f32.mrb[1].mxu0 }
 0x114   : > { %v421_v23 = vpop.f32.mrb[2].mxu0 }
 0x115   : > { %v425_v24 = vmax.f32 %v419_v21, 0.0  ;;  %v422_v25 = vadd.f32 %v568_v19, %v421_v23  ;;  %v423_v26 = vpop.f32.mrb[3].mxu0 }
 0x117   : > { %427 = vst [vmem:[%s244_s13] sm:$0xff] %v425_v24  ;;  %v426_v27 = vmax.f32 %v422_v25, 0.0 }
 0x119   : > { %428 = vst [vmem:[%s244_s13 + $0x8] sm:$0xff] %v426_v27  ;;  %v435_v28 = vadd.f32 %v426_v27, %v425_v24 }
 0x11b   : > { %v436_v29 = vrot.slane %v435_v28, 4 }
 0x11d   : > { %v437_v30 = vadd.f32 %v436_v29, %v435_v28 }
 0x11f   : > { %v438_v31 = vrot.slane %v437_v30, 2 }
 0x121   : > { %v439_v32 = vadd.f32 %v438_v31, %v437_v30 }
 0x123   : > { %v440_v33 = vrot.slane %v439_v32, 1 }
 0x125   : > { %v441_v35 = vadd.f32 %v440_v33, %v439_v32 }
 0x127   : > { %v442_v36 = vadd.f32 %v441_v35, %v434_v34 }
 0x129   : > { %443 = vst [vmem:[%s717_s27] sm:$0x1] %v442_v36 }
 0x12a PF: > { %s15_s17 = sadd.s32 1, %s655_s17   ;;  %s787_s15 = smov %s651_s16 }
 0x12b   : > { %p12_p5 = scmp.ge.s32.totalorder %s15_s17, 4   ;;  %s788_s16 = smov %s790_s18 }
 0x12d   :  { %14 = sbr.rel (!%p12_p5) target bundleno = 2 (0x2), region = 78 }

</bundles_post_ra>
